<compile_context>
chip_gen: v5e
topology: v5e:2x2
jax: 0.10.0
libtpu: 0.0.40
codegen_flags: <defaults>
</compile_context>

<pallas_src>
import math

import jax
import jax.numpy as jnp
from jax.experimental import pallas as pl
from jax.experimental.pallas import tpu as pltpu


_LANE = 128
_TILE_BUDGET_BYTES = 24 * 1024 * 1024   # double-buffered tile budget (all gens)
_MAX_PACKED_LANES = 512                 # cap on lcm-based packed output width


def _round_up(x, m):
    return ((x + m - 1) // m) * m


def _choose_tm(n_rows, per_row_bytes, min_tm=8):
    """Largest 8-aligned row tile under the VMEM budget, keeping >= 2 grid steps."""
    tm_budget = max(min_tm, (_TILE_BUDGET_BYTES // max(per_row_bytes, 1)) // 8 * 8)
    # v7x has 2 TensorCores; "parallel" only shards the grid if there are >= 2 steps.
    half = max(min_tm, _round_up(pl.cdiv(max(n_rows, 1), 2), 8))
    return max(min_tm, min(tm_budget, half))


def _vmem_limit(total_tile_bytes):
    """Explicit scoped-VMEM limit: tiles + headroom, capped below v7x's 64 MiB."""
    limit = _round_up(total_tile_bytes + 4 * 1024 * 1024, 1024 * 1024)
    return int(min(max(limit, 16 * 1024 * 1024), 48 * 1024 * 1024))


# ---------------------------------------------------------------------------
# Lane-dense kernel: `pack` batch rows per lane_width-wide output row.
#   tau_ref:  (tm, pack)          packed tau rows
#   e_ref:    (pack, L)           structured expansion weight (MXU operand)
#   bc_ref:   (1, L)              fused bias [b | b0] tiled over packed rows
#   mask_ref: (1, L)  f32 0/1     1.0 on sin lanes, 0.0 on the linear (v2) lane
#   o_ref:    (tm, L)             full-lane unmasked stores
# ---------------------------------------------------------------------------
def _t2v_lane_dense_kernel(tau_ref, e_ref, bc_ref, mask_ref, o_ref):
    tau_p = tau_ref[...].astype(jnp.float32)                         # (tm, pack)
    # Expansion + FMA on the MXU; VPU only does sin/select/cast below.
    z = jnp.dot(tau_p, e_ref[...], preferred_element_type=jnp.float32) + bc_ref[...]
    o_ref[...] = jnp.where(mask_ref[...] != 0.0, jnp.sin(z), z).astype(o_ref.dtype)


# ---------------------------------------------------------------------------
# Fallback kernel (out_features does not pack into <= _MAX_PACKED_LANES lanes).
#   tau_ref: (tm, 1)   wc/bc/mask: (1, F)   o_ref: (tm, F)  (masked stores OK)
# ---------------------------------------------------------------------------
def _t2v_rowtile_kernel(tau_ref, wc_ref, bc_ref, mask_ref, o_ref):
    tau = tau_ref[...].astype(jnp.float32)                           # (tm, 1)
    z = tau * wc_ref[...] + bc_ref[...]                              # K=1 outer product (VPU)
    o_ref[...] = jnp.where(mask_ref[...] != 0.0, jnp.sin(z), z).astype(o_ref.dtype)


def sine_activation(tau, w, b, w0, b0):
    n, in_features = tau.shape
    if in_features != 1:
        # The PyTorch module's `+ b` broadcast is only well-defined here.
        raise ValueError("SineActivation Pallas kernel requires in_features == 1")
    k = w.shape[1]
    out_features = k + 1
    out_dtype = tau.dtype
    out_itemsize = jnp.dtype(out_dtype).itemsize

    # Fuse + pre-cast params once in the wrapper (no per-step casts in-kernel).
    wc = jnp.concatenate([w, w0], axis=1).astype(jnp.float32).reshape(out_features)
    bc = jnp.concatenate([b, b0], axis=1).astype(jnp.float32).reshape(out_features)

    lane_width = (out_features * _LANE) // math.gcd(out_features, _LANE)  # lcm(F, 128)
    lane_dense = lane_width <= _MAX_PACKED_LANES

    if lane_dense:
        pack = lane_width // out_features
        lane = jnp.arange(lane_width)
        feat = lane % out_features
        group = lane // out_features
        # E[g, l] = wc[l % F] iff lane l belongs to packed batch row g, else 0.
        e_mat = jnp.where(group[None, :] == jnp.arange(pack)[:, None],
                          wc[feat][None, :], 0.0).astype(jnp.float32)   # (pack, L)
        bc_row = bc[feat][None, :].astype(jnp.float32)                  # (1, L)
        mask_row = (feat < (out_features - 1)).astype(jnp.float32)[None, :]  # (1, L)

        n_pack = pl.cdiv(max(n, 1), pack)
        # tau block lane-pads to 128 lanes in VMEM regardless of `pack`.
        per_row_bytes = 2 * (_LANE * 4) + 2 * (lane_width * out_itemsize)
        tm = _choose_tm(n_pack, per_row_bytes)
        n_pack_pad = _round_up(n_pack, tm)
        n_pad = n_pack_pad * pack

        tau_in = jnp.pad(tau, ((0, n_pad - n), (0, 0))) if n_pad != n else tau
        tau_in = tau_in.reshape(n_pack_pad, pack)

        out_packed = pl.pallas_call(
            _t2v_lane_dense_kernel,
            out_shape=jax.ShapeDtypeStruct((n_pack_pad, lane_width), out_dtype),
            grid_spec=pltpu.PrefetchScalarGridSpec(
                num_scalar_prefetch=0,
                grid=(n_pack_pad // tm,),
                in_specs=[
                    pl.BlockSpec((tm, pack), lambda i: (i, 0)),
                    pl.BlockSpec((pack, lane_width), lambda i: (0, 0)),
                    pl.BlockSpec((1, lane_width), lambda i: (0, 0)),
                    pl.BlockSpec((1, lane_width), lambda i: (0, 0)),
                ],
                out_specs=pl.BlockSpec((tm, lane_width), lambda i: (i, 0)),
            ),
            compiler_params=pltpu.CompilerParams(
                dimension_semantics=("parallel",),
                vmem_limit_bytes=_vmem_limit(tm * per_row_bytes)),
        )(tau_in, e_mat, bc_row, mask_row)
        # Row-major (n_pack, L) is exactly row-major (n_pack*pack, F): free reshape.
        return out_packed.reshape(n_pack_pad * pack, out_features)[:n]

    # Fallback: plain row tiling with masked stores (rare: lcm(F,128) > 512).
    wc_row = wc[None, :]
    bc_row = bc[None, :]
    mask_row = (jnp.arange(out_features) < (out_features - 1)).astype(jnp.float32)[None, :]

    per_row_bytes = 2 * (_LANE * 4) + 2 * (_round_up(out_features, _LANE) * out_itemsize)
    tm = _choose_tm(n, per_row_bytes)
    n_pad = _round_up(max(n, 1), tm)
    tau_in = jnp.pad(tau, ((0, n_pad - n), (0, 0))) if n_pad != n else tau

    out = pl.pallas_call(
        _t2v_rowtile_kernel,
        out_shape=jax.ShapeDtypeStruct((n_pad, out_features), out_dtype),
        grid_spec=pltpu.PrefetchScalarGridSpec(
            num_scalar_prefetch=0,
            grid=(n_pad // tm,),
            in_specs=[
                pl.BlockSpec((tm, 1), lambda i: (i, 0)),
                pl.BlockSpec((1, out_features), lambda i: (0, 0)),
                pl.BlockSpec((1, out_features), lambda i: (0, 0)),
                pl.BlockSpec((1, out_features), lambda i: (0, 0)),
            ],
            out_specs=pl.BlockSpec((tm, out_features), lambda i: (i, 0)),
        ),
        compiler_params=pltpu.CompilerParams(
            dimension_semantics=("parallel",),
            vmem_limit_bytes=_vmem_limit(tm * per_row_bytes)),
    )(tau_in, wc_row, bc_row, mask_row)
    return out[:n]


def _reference(tau, w, b, w0, b0):
    return jnp.concatenate([jnp.sin(tau @ w + b), tau @ w0 + b0], axis=1)


if __name__ == "__main__":
    key = jax.random.PRNGKey(0)

    # Primary case: standard Time2Vec shapes (in_features=1, out_features=32).
    in_features, out_features, batch = 1, 32, 64
    k_tau, k_w0, k_b0, k_w, k_b = jax.random.split(key, 5)
    tau = jax.random.normal(k_tau, (batch, in_features), jnp.float32)
    w0 = jax.random.normal(k_w0, (in_features, 1), jnp.float32)
    b0 = jax.random.normal(k_b0, (in_features, 1), jnp.float32)
    w = jax.random.normal(k_w, (in_features, out_features - 1), jnp.float32)
    b = jax.random.normal(k_b, (in_features, out_features - 1), jnp.float32)

    out = sine_activation(tau, w, b, w0, b0)
    jax.block_until_ready(out)
    assert out.shape == (batch, out_features)
    assert jnp.allclose(out, _reference(tau, w, b, w0, b0), atol=1e-5, rtol=1e-5)

    # Ragged batch (exercises wrapper-side padding in the lane-dense path).
    tau2 = jax.random.normal(jax.random.PRNGKey(1), (70, in_features), jnp.float32)
    out2 = sine_activation(tau2, w, b, w0, b0)
    jax.block_until_ready(out2)
    assert jnp.allclose(out2, _reference(tau2, w, b, w0, b0), atol=1e-5, rtol=1e-5)

    # lcm-packed path (out_features=48 -> lane_width=384, pack=8): unmasked stores.
    of3, batch3 = 48, 20
    kk = jax.random.split(jax.random.PRNGKey(2), 5)
    tau3 = jax.random.normal(kk[0], (batch3, 1), jnp.float32)
    w03 = jax.random.normal(kk[1], (1, 1), jnp.float32)
    b03 = jax.random.normal(kk[2], (1, 1), jnp.float32)
    w3 = jax.random.normal(kk[3], (1, of3 - 1), jnp.float32)
    b3 = jax.random.normal(kk[4], (1, of3 - 1), jnp.float32)
    out3 = sine_activation(tau3, w3, b3, w03, b03)
    jax.block_until_ready(out3)
    assert jnp.allclose(out3, _reference(tau3, w3, b3, w03, b03), atol=1e-5, rtol=1e-5)

    # Fallback path (lcm(out_features, 128) > 512 -> masked row-tile stores).
    of4, batch4 = 200, 16
    kk4 = jax.random.split(jax.random.PRNGKey(3), 5)
    tau4 = jax.random.normal(kk4[0], (batch4, 1), jnp.float32)
    w04 = jax.random.normal(kk4[1], (1, 1), jnp.float32)
    b04 = jax.random.normal(kk4[2], (1, 1), jnp.float32)
    w4 = jax.random.normal(kk4[3], (1, of4 - 1), jnp.float32)
    b4 = jax.random.normal(kk4[4], (1, of4 - 1), jnp.float32)
    out4 = sine_activation(tau4, w4, b4, w04, b04)
    jax.block_until_ready(out4)
    assert jnp.allclose(out4, _reference(tau4, w4, b4, w04, b04), atol=1e-5, rtol=1e-5)

    print("KERNEL_OK")
</pallas_src>

<mosaic_0001>
module attributes {stable_mosaic.version = 11 : i64} {
  func.func @_t2v_lane_dense_kernel(%arg0: i32, %arg1: memref<8x4xf32, #tpu.memory_space<vmem>>, %arg2: memref<4x128xf32, #tpu.memory_space<vmem>>, %arg3: memref<1x128xf32, #tpu.memory_space<vmem>>, %arg4: memref<1x128xf32, #tpu.memory_space<vmem>>, %arg5: memref<8x128xf32, #tpu.memory_space<vmem>>) attributes {dimension_semantics = [#tpu.dimension_semantics<parallel>], iteration_bounds = array<i64: 2>, scalar_prefetch = 0 : i64, scratch_operands = 0 : i64, tpu.core_type = #tpu.core_type<tc>, window_params = [{transform_indices = @transform_0, window_bounds = array<i64: 8, 4>}, {pipeline_mode = #tpu.pipeline_mode<synchronous>, transform_indices = @transform_1, window_bounds = array<i64: 4, 128>}, {pipeline_mode = #tpu.pipeline_mode<synchronous>, transform_indices = @transform_2, window_bounds = array<i64: 1, 128>}, {pipeline_mode = #tpu.pipeline_mode<synchronous>, transform_indices = @transform_3, window_bounds = array<i64: 1, 128>}, {transform_indices = @transform_4, window_bounds = array<i64: 8, 128>}]} {
    %c0 = arith.constant 0 : index
    %c0_0 = arith.constant 0 : index
    %0 = vector.load %arg1[%c0, %c0_0] : memref<8x4xf32, #tpu.memory_space<vmem>>, vector<8x4xf32>
    %c0_1 = arith.constant 0 : index
    %c0_2 = arith.constant 0 : index
    %1 = vector.load %arg2[%c0_1, %c0_2] : memref<4x128xf32, #tpu.memory_space<vmem>>, vector<4x128xf32>
    %cst = arith.constant dense<0.000000e+00> : vector<8x128xf32>
    %2 = tpu.matmul %0, %1, %cst {dimension_numbers = #tpu.dot_dimension_numbers<[1], [0], [0], [1], [0, 0, 1, 1], [], []>} : vector<8x4xf32>, vector<4x128xf32>, vector<8x128xf32> -> vector<8x128xf32>
    %c0_3 = arith.constant 0 : index
    %c0_4 = arith.constant 0 : index
    %3 = vector.load %arg3[%c0_3, %c0_4] : memref<1x128xf32, #tpu.memory_space<vmem>>, vector<1x128xf32>
    %4 = vector.broadcast %3 : vector<1x128xf32> to vector<8x128xf32>
    %5 = arith.addf %2, %4 : vector<8x128xf32>
    %c0_5 = arith.constant 0 : index
    %c0_6 = arith.constant 0 : index
    %6 = vector.load %arg4[%c0_5, %c0_6] : memref<1x128xf32, #tpu.memory_space<vmem>>, vector<1x128xf32>
    %cst_7 = arith.constant 0.000000e+00 : f32
    %7 = vector.broadcast %cst_7 : f32 to vector<1x128xf32>
    %8 = arith.cmpf one, %6, %7 : vector<1x128xf32>
    %9 = math.sin %5 : vector<8x128xf32>
    %10 = vector.shape_cast %8 : vector<1x128xi1> to vector<1x128xi1>
    %11 = vector.broadcast %10 : vector<1x128xi1> to vector<8x128xi1>
    %12 = arith.select %11, %9, %5 : vector<8x128xi1>, vector<8x128xf32>
    %c0_8 = arith.constant 0 : index
    %c0_9 = arith.constant 0 : index
    %13 = vector.load %arg5[%c0_8, %c0_9] : memref<8x128xf32, #tpu.memory_space<vmem>>, vector<8x128xf32>
    tpu.vector_store %arg5[%c0_8, %c0_9], %12 {strides = array<i32>} : memref<8x128xf32, #tpu.memory_space<vmem>>, vector<8x128xf32>,
    return
  }
  func.func @transform_0(%arg0: i32) -> (i32, i32) {
    %c0_i32 = arith.constant 0 : i32
    %c0_i32_0 = arith.constant 0 : i32
    return %arg0, %c0_i32 : i32, i32
  }
  func.func @transform_1(%arg0: i32) -> (i32, i32) {
    %c0_i32 = arith.constant 0 : i32
    %c0_i32_0 = arith.constant 0 : i32
    %c0_i32_1 = arith.constant 0 : i32
    return %c0_i32, %c0_i32_0 : i32, i32
  }
  func.func @transform_2(%arg0: i32) -> (i32, i32) {
    %c0_i32 = arith.constant 0 : i32
    %c0_i32_0 = arith.constant 0 : i32
    %c0_i32_1 = arith.constant 0 : i32
    return %c0_i32, %c0_i32_0 : i32, i32
  }
  func.func @transform_3(%arg0: i32) -> (i32, i32) {
    %c0_i32 = arith.constant 0 : i32
    %c0_i32_0 = arith.constant 0 : i32
    %c0_i32_1 = arith.constant 0 : i32
    return %c0_i32, %c0_i32_0 : i32, i32
  }
  func.func @transform_4(%arg0: i32) -> (i32, i32) {
    %c0_i32 = arith.constant 0 : i32
    %c0_i32_0 = arith.constant 0 : i32
    return %arg0, %c0_i32 : i32, i32
  }
}

</mosaic_0001>

<bundles_post_ra>
// kernel: tpu_custom_call.1
= control target key start
LH: loop header
LB: loop body
LE: loop exit
PB: predicated region body
PF: predicated region fallthrough
CT: control target
= control target key end

     0   :  { %9 = vsyncpa [#allocation3], 0  ;;  %s790_s0 = inlined_call_operand.vmem [shape: f32[16,4], index: 0, kind: input, shape index: {}]   ;;  %s791_s1 = inlined_call_operand.vmem [shape: f32[4,128], index: 1, kind: input, shape index: {}]   ;;  %s792_s2 = inlined_call_operand.vmem [shape: f32[1,128], index: 2, kind: input, shape index: {}]   ;;  %s793_s3 = inlined_call_operand.vmem [shape: f32[1,128], index: 3, kind: input, shape index: {}]   ;;  %s794_s4 = inlined_call_operand.hbm [shape: f32[16,128], index: 4, kind: output, shape index: {}]  }
   0x1   :  { %11 = vsyncpa [#allocation3 + $0x1], 0  ;;  %s622_s15 = smov 0   ;;  %s624_s16 = smov 0  }
   0x2   :  { %s626_s17 = smov 0   ;;  %s628_s18 = smov 0  }
   0x3 LB: > { %s643_s19 = sadd.s32 4294967295, %s588_s18   ;;  %s464_s20 = sadd.s32 4294967294, %s588_s18   ;;  %s588_s18 = sphi %s628_s18, %s802_s18   ;;  %s584_s17 = sphi %s626_s17, %s801_s17   ;;  %s580_s16 = sphi %s624_s16, %s800_s16   ;;  %s576_s15 = sphi %s622_s15, %s799_s15  }
   0x4   : > { %s647_s21 = sadd.s32 1, %s588_s18   ;;  %s113_s22 = sadd.s32 1, %s584_s17 }
   0x5   : > { %s110_s23 = ssub.s32 %s588_s18, %s647_s21  ;;  %p123_p0 = scmp.ne.s32.totalorder %s584_s17, %s580_s16 }
   0x6   : > { %p111_p1 = scmp.eq.s32.totalorder %s110_s23, 0  ;;  %p124_p2 = scmp.eq.s32.totalorder %s643_s19, 1 }
   0x7   : > { %p129_p3 = scmp.ne.s32.totalorder %s580_s16, %s576_s15  ;;  %p130_p4 = scmp.eq.s32.totalorder %s464_s20, 1 }
   0x8   : > { %s658_s24 = scalar_select %p111_p1, %s584_s17, %s113_s22  }
   0x9   : > { %p660_p5 = por %p124_p2, %p123_p0  ;;  %p664_p6 = por %p130_p4, %p129_p3 }
   0xa   : > { %p467_p7 = scmp.ge.s32.totalorder %s588_s18, 1  ;;  %p164_p8 = scmp.lt.s32.totalorder %s588_s18, 3 }
   0xc   : > { %p165_p9 = pnand %p467_p7, %p164_p8 }
   0xd   : > { %p189_p10 = scmp.lt.s32.totalorder (!%p165_p9), %s643_s19, 1  ;;  %s186_s12 = sand.u32 (!%p165_p9), 1, %s580_s16  }
   0xe   : > { %168 = sbr.rel (%p165_p9) target bundleno = 252 (0xfc), region = 36  ;;  %s468_s13 = sshll.u32 (!%p165_p9), %s186_s12, 3 }
   0xf   : > { %s476_s14 = sshll.u32 (!%p165_p9), %s643_s19, 3  ;;  %s188_s27 = scalar_lea.vmem (!%p165_p9), [#allocation2], %s468_s13 }
  0x10   : > { %s400_s23 = scalar_lea.hbm (!%p165_p9), %s794_s4, %s476_s14  ;;  %s402_s28 = sshll.u32 (!%p165_p9), %s188_s27, 4  ;;  %s403_s28 = int_to_ptr.vmem [resolvable:$true] %s402_s28 }
  0x11   : > { %s546_s8 = scalar_lea.hbm (!%p165_p9), %s794_s4, 16 }
  0x13   : > { %v194_v0 = vld [vmem:[%s791_s1] sm:$0xf]  ;;  %vm203_vm0 = vcmask 1043456   ;;  %s190_s29 = scalar_select %p189_p10, %s643_s19, 1  ;;  %vm199_vm1 = vcmask 31744  }
  0x14   : > { %470 = vmatpush.msk.msra.mxu0 %vm203_vm0, %v194_v0  ;;  %v525_v2 = vld [vmem:[%s792_s2] ss:$0 sm:$0xff]  ;;  %v590_v16 = vmov 683565275   ;;  %v591_v18 = vmov 2475754826  }
  0x15   : > { %s469_s30 = sshll.u32 %s190_s29, 3  ;;  %v592_v21 = vmov 2131351028   ;;  %v593_v24 = vmov 2102212464   ;;  %v596_v0 = vmov 0  }
  0x16   : > { %s192_s7 = scalar_lea.vmem %s790_s0, %s469_s30  ;;  %v594_v27 = vmov 920167782   ;;  %v595_v30 = vmov 1326507024   ;;  %s404_s29 = sshll.u32 %s400_s23, 4  ;;  %s405_s29 = int_to_ptr.hbm [resolvable:$true] %s404_s29 }
  0x17   : > { %v193_v1 = vld [vmem:[%s192_s7] sm:$0xff]  ;;  %s390_s19 = scalar_lea.sflag [#allocation3], %s186_s12  ;;  %s540_s30 = sshra.s32 %s405_s29, 4  ;;  %s541_s30 = int_to_ptr.hbm [resolvable:$true] %s540_s30 }
  0x18   : > { %471 = vmatmul.msk.f32.vlgmr.msra.gmra.mxu0 %vm199_vm1, %v193_v1  ;;  %s542_s5 = scalar_lea.hbm %s541_s30, 8  ;;  %p547_p0 = scmp.lt.s32.totalorder %s541_s30, %s794_s4 }
  0x19   : > { %p543_p11 = scmp.ne.s32.totalorder %s541_s30, %s542_s5  ;;  %p548_p1 = scmp.lt.s32.totalorder %s546_s8, %s542_s5 }
  0x1b   : > { %p544_p12 = pnand %p543_p11, %p660_p5  ;;  %p549_p2 = por %p548_p1, %p547_p0 }
  0x1d   : > { %p545_p13 = pneg %p544_p12 }
  0x1f   : > { %p550_p3 = pnand %p549_p2, %p545_p13 }
  0x95   : > { %v224_v3 = vpop.f32.mrf.mxu0 }
  0x96   : > { %v681_v4 = vadd.f32 %v525_v2, %v224_v3 }
  0x98   : > { %v232_v5 = vand.u32 2139095040, %v681_v4  ;;  %v229_v8 = vand.u32 2147483647, %v681_v4  ;;  %vm231_vm14 = vcmp.lt.s32.totalorder %v681_v4, 0 }
  0x9a   : > { %v233_v6 = vshrl.u32 %v232_v5, 23  ;;  %v236_v11 = vand.u32 8388607, %v229_v8  ;;  %vm739_vm15 = vcmp.le.f32.partialorder %v229_v8, 0.7853982 }
  0x9b   : > { %v227_v8 = vld [vmem:[%s793_s3] sm:$0x1] }
  0x9c   : > { %v472_v7 = vadd.s32 4294967169, %v233_v6  ;;  %v237_v15 = vor.u32 8388608, %v236_v11  ;;  %vm228_vm0 = vcmp.ne.f32.partialorder %v227_v8, 0.0 }
  0x9e   : > { %v239_v9 = vadd.s32 1, %v472_v7  ;;  %v698_v37 = vshll.u32 %v237_v15, 8 }
  0xa0   : > { %vm240_vm2 = vcmp.gt.s32.totalorder %v239_v9, 0  ;;  %v278_v46 = vand.u32 65535, %v698_v37  ;;  %v279_v47 = vshrl.u32 %v698_v37, 16 }
  0xa1   : > { %v241_v10 = vsel %vm240_vm2, %v239_v9, 0 }
  0xa2   : > { %v243_v12 = vand.u32 31, %v241_v10  ;;  %v689_v14 = vshrl.u32 %v241_v10, 5 }
  0xa4   : > { %v687_v13 = vsub.s32 32, %v243_v12  ;;  %v246_v17 = vshll.u32 %v590_v16, %v243_v12  ;;  %v249_v19 = vshll.u32 %v591_v18, %v243_v12  ;;  %v252_v23 = vshll.u32 %v592_v21, %v243_v12 }
  0xa5   : > { %v255_v26 = vshll.u32 %v593_v24, %v243_v12  ;;  %v258_v29 = vshll.u32 %v594_v27, %v243_v12  ;;  %vm261_vm3 = vcmp.lt.s32.totalorder %v689_v14, 1  ;;  %vm264_vm4 = vcmp.lt.s32.totalorder %v689_v14, 4 }
  0xa6   : > { %v247_v20 = vshrl.u32 %v591_v18, %v687_v13  ;;  %v250_v22 = vshrl.u32 %v592_v21, %v687_v13  ;;  %v253_v25 = vshrl.u32 %v593_v24, %v687_v13  ;;  %v256_v28 = vshrl.u32 %v594_v27, %v687_v13 }
  0xa7   : > { %v259_v31 = vshrl.u32 %v595_v30, %v687_v13  ;;  %vm263_vm5 = vcmp.lt.s32.totalorder %v689_v14, 3  ;;  %vm262_vm6 = vcmp.lt.s32.totalorder %v689_v14, 2  ;;  %v245_v11 = vshrl.u32 %v590_v16, %v687_v13 }
  0xa8   : > { %v248_v32 = vor.u32 %v247_v20, %v246_v17  ;;  %v251_v33 = vor.u32 %v250_v22, %v249_v19  ;;  %v254_v34 = vor.u32 %v253_v25, %v252_v23  ;;  %v257_v35 = vor.u32 %v256_v28, %v255_v26 }
  0xa9   : > { %v260_v36 = vor.u32 %v259_v31, %v258_v29 }
  0xaa   : > { %v269_v38 = vsel %vm261_vm3, %v248_v32, %v251_v33  ;;  %v273_v39 = vsel %vm261_vm3, %v251_v33, %v254_v34  ;;  %v270_v40 = vsel %vm264_vm4, %v257_v35, 920167782  ;;  %v266_v7 = vsel %vm264_vm4, %v254_v34, 2102212464 }
  0xab   : > { %v274_v41 = vsel %vm264_vm4, %v260_v36, 1326507024  ;;  %v271_v42 = vsel %vm263_vm5, %v254_v34, %v270_v40  ;;  %v265_v20 = vsel %vm261_vm3, %v245_v11, %v248_v32  ;;  %v267_v21 = vsel %vm263_vm5, %v251_v33, %v266_v7 }
  0xac   : > { %v275_v43 = vsel %vm263_vm5, %v257_v35, %v274_v41  ;;  %v272_v44 = vsel %vm262_vm6, %v269_v38, %v271_v42  ;;  %v268_v13 = vsel %vm262_vm6, %v265_v20, %v267_v21  ;;  %vm372_vm5 = vweird.f32 %v681_v4 }
  0xad   : > { %v276_v45 = vsel %vm262_vm6, %v273_v39, %v275_v43  ;;  %v302_v50 = vand.u32 65535, %v272_v44  ;;  %v303_v51 = vshrl.u32 %v272_v44, 16  ;;  %v322_v29 = vmul.u32 %v698_v37, %v268_v13 }
  0xae   : > { %v280_v48 = vand.u32 65535, %v276_v45  ;;  %v281_v49 = vshrl.u32 %v276_v45, 16 }
  0xaf   : > { %v305_v54 = vmul.u32 %v303_v51, %v278_v46  ;;  %v306_v55 = vmul.u32 %v302_v50, %v279_v47  ;;  %v304_v59 = vmul.u32 %v302_v50, %v278_v46  ;;  %v307_v63 = vmul.u32 %v303_v51, %v279_v47 }
  0xb0   : > { %v283_v52 = vmul.u32 %v281_v49, %v278_v46  ;;  %v284_v53 = vmul.u32 %v280_v48, %v279_v47  ;;  %v282_v56 = vmul.u32 %v280_v48, %v278_v46  ;;  %v285_v58 = vmul.u32 %v281_v49, %v279_v47 }
  0xb1   : > { %v308_v60 = vshll.u32 %v305_v54, 16  ;;  %v310_v2 = vshll.u32 %v306_v55, 16  ;;  %v309_v18 = vshrl.u32 %v305_v54, 16  ;;  %v311_v24 = vshrl.u32 %v306_v55, 16 }
  0xb2   : > { %v286_v57 = vshll.u32 %v283_v52, 16  ;;  %v288_v61 = vshll.u32 %v284_v53, 16  ;;  %v287_v12 = vshrl.u32 %v283_v52, 16  ;;  %v289_v22 = vshrl.u32 %v284_v53, 16 }
  0xb3   : > { %vm312_vm8 = vc.u32 %v304_v59, %v308_v60  ;;  %v314_v3 = vadd.s32 %v308_v60, %v304_v59 }
  0xb4   : > { %vm290_vm7 = vc.u32 %v282_v56, %v286_v57  ;;  %v292_v62 = vadd.s32 %v286_v57, %v282_v56  ;;  %v313_v6 = vsel %vm312_vm8, 1, %v596_v0 }
  0xb5   : > { %v291_v1 = vsel %vm290_vm7, 1, %v596_v0  ;;  %v315_v10 = vadd.s32 %v313_v6, %v307_v63  ;;  %vm316_vm10 = vc.u32 %v314_v3, %v310_v2  ;;  %v318_v27 = vadd.s32 %v314_v3, %v310_v2 }
  0xb6   : > { %v293_v5 = vadd.s32 %v291_v1, %v285_v58  ;;  %vm294_vm9 = vc.u32 %v292_v62, %v288_v61  ;;  %v317_v17 = vsel %vm316_vm10, 1, %v596_v0 }
  0xb7   : > { %v295_v9 = vsel %vm294_vm9, 1, %v596_v0  ;;  %v319_v19 = vadd.s32 %v317_v17, %v315_v10  ;;  %v384_v10 = vsel %vm228_vm0, 1, %v596_v0 }
  0xb8   : > { %v297_v15 = vadd.s32 %v295_v9, %v293_v5 }
  0xb9   : > { %v320_v25 = vadd.s32 %v319_v19, %v309_v18  ;;  %v385_v19 = vperm.slane %v384_v10, 0 }
  0xba   : > { %v298_v23 = vadd.s32 %v297_v15, %v287_v12 }
  0xbb   : > { %v321_v16 = vadd.s32 %v320_v25, %v311_v24  ;;  %vm386_vm4 = vcmp.eq.s32.totalorder %v385_v19, 1 }
  0xbc   : > { %v299_v26 = vadd.s32 %v298_v23, %v289_v22 }
  0xbd   : > { %v325_v28 = vadd.s32 1, %v321_v16 }
  0xbe   : > { %vm324_vm11 = vc.u32 %v299_v26, %v318_v27  ;;  %v323_v14 = vadd.s32 %v318_v27, %v299_v26 }
  0xbf   : > { %v326_v30 = vsel %vm324_vm11, %v325_v28, %v321_v16 }
  0xc0   : > { %v327_v31 = vadd.s32 %v326_v30, %v322_v29 }
  0xc2   : > { %v328_v32 = vadd.s32 536870912, %v327_v31 }
  0xc4   : > { %v329_v34 = vshrl.u32 %v328_v32, 30 }
  0xc6   : > { %v330_v35 = vshll.u32 %v329_v34, 30  ;;  %v353_v55 = vsub.s32 4, %v329_v34 }
  0xc8   : > { %v331_v33 = vsub.s32 %v327_v31, %v330_v35  ;;  %v354_v60 = vsel %vm231_vm14, %v353_v55, %v329_v34 }
  0xc9   : > { %v356_v63 = vsel %vm739_vm15, 0, %v354_v60 }
  0xca   : > { %vm332_vm12 = vcmp.lt.s32.totalorder %v331_v33, 0  ;;  %v333_v36 = vsub.s32 0, %v331_v33  ;;  %v373_v6 = vadd.s32 3, %v356_v63 }
  0xcc   : > { %v334_v38 = vsel %vm332_vm12, %v333_v36, %v331_v33  ;;  %v374_v15 = vand.u32 3, %v373_v6 }
  0xcd   : > { %v335_v39 = vclz %v334_v38 }
  0xce   : > { %vm376_vm1 = vcmp.eq.s32.totalorder %v374_v15, 0  ;;  %vm379_vm2 = vcmp.eq.s32.totalorder %v374_v15, 2  ;;  %vm375_vm3 = vcmp.lt.s32.totalorder %v374_v15, 2 }
  0xcf   : > { %v473_v40 = vadd.s32 4294967294, %v335_v39 }
  0xd1   : > { %vm474_vm13 = vcmp.lt.s32.totalorder %v473_v40, 0 }
  0xd2   : > { %v338_v41 = vsel %vm474_vm13, 0, %v473_v40 }
  0xd3   : > { %v339_v42 = vsub.s32 32, %v338_v41  ;;  %v343_v43 = vsub.s32 4294967266, %v338_v41  ;;  %v340_v44 = vshll.u32 %v331_v33, %v338_v41 }
  0xd5   : > { %v341_v45 = vshrl.u32 %v323_v14, %v339_v42  ;;  %v344_v46 = vadd.s32 127, %v343_v43 }
  0xd7   : > { %v342_v37 = vor.u32 %v341_v45, %v340_v44  ;;  %v345_v47 = vshll.u32 %v344_v46, 23 }
  0xd9   : > { %v346_v48 = vor.u32 4788187, %v345_v47  ;;  %v349_v50 = vcvt.s32.f32 %v342_v37 }
  0xdb   : > { %v347_v49 = vand.u32 2147483647, %v346_v48 }
  0xdd   : > { %v350_v51 = vmul.f32 %v349_v50, %v347_v49 }
  0xdf   : > { %v351_v52 = vxor.u32 2147483648, %v350_v51 }
  0xe1   : > { %v352_v54 = vsel %vm231_vm14, %v351_v52, %v350_v51 }
  0xe2   : > { %v355_v56 = vsel %vm739_vm15, %v681_v4, %v352_v54 }
  0xe3   : > { %v357_v57 = vmul.f32 %v355_v56, %v355_v56 }
  0xe5   : > { %v358_v58 = vmul.f32 -0.001358992, %v357_v57  ;;  %v365_v59 = vmul.f32 -0.00019511016, %v357_v57 }
  0xe7   : > { %v359_v61 = vadd.f32 0.041655596, %v358_v58  ;;  %v366_v62 = vadd.f32 0.008332121, %v365_v59 }
  0xe9   : > { %v360_v1 = vmul.f32 %v359_v61, %v357_v57  ;;  %v367_v2 = vmul.f32 %v366_v62, %v357_v57 }
  0xeb   : > { %v361_v3 = vadd.f32 -0.4999988, %v360_v1  ;;  %v368_v5 = vadd.f32 -0.16666654, %v367_v2 }
  0xed   : > { %v362_v7 = vmul.f32 %v361_v3, %v357_v57  ;;  %v369_v9 = vmul.f32 %v368_v5, %v357_v57 }
  0xef   : > { %v363_v11 = vadd.f32 1.0, %v362_v7  ;;  %v370_v12 = vadd.f32 1.0, %v369_v9 }
  0xf1   : > { %v371_v17 = vmul.f32 %v370_v12, %v355_v56  ;;  %v380_v18 = vxor.u32 2147483648, %v363_v11 }
  0xf3   : > { %v377_v20 = vxor.u32 2147483648, %v371_v17  ;;  %v381_v21 = vsel %vm379_vm2, %v380_v18, %v371_v17 }
  0xf5   : > { %v378_v0 = vsel %vm376_vm1, %v363_v11, %v377_v20 }
  0xf6   : > { %v382_v22 = vsel %vm375_vm3, %v378_v0, %v381_v21 }
  0xf7   : > { %v383_v23 = vsel %vm372_vm5, nan, %v382_v22 }
  0xf8   : > { %v387_v24 = vsel %vm386_vm4, %v383_v23, %v681_v4 }
  0xf9   : > { %388 = vst [vmem:[%s188_s27] sm:$0xff] %v387_v24 }
  0xfa   : > { %553 = shalt.err (!%p550_p3)
}
  0xfb   : > { %479 = dma.vmem_to_hbm [thread:$0]  (%p660_p5), %s403_s28, 128, %s405_s29, %s390_s19  }
  0xfc PF: > { %p485_p4 = scmp.ge.s32.totalorder %s588_s18, 2  ;;  %s416_s11 = sand.u32 1, %s576_s15  }
  0xfd   : > { %s417_s12 = scalar_lea.sflag [#allocation3], %s416_s11 }
  0xfe   : > { %p482_p7 = pnand %p485_p4, %p664_p6 }
 0x100   : > { %p483_p8 = pneg %p482_p7 }
 0x102   : > { %571 = dma.done.wait (%p483_p8), %s417_s12, 128  }
 0x103   : > { %573 = vsyncadd (%p483_p8), %s417_s12, 4294967168  ;;  %p14_p9 = scmp.ge.s32.totalorder %s647_s21, 4   ;;  %s799_s15 = smov %s580_s16 }
 0x104   : > { %s800_s16 = smov %s584_s17  ;;  %s801_s17 = smov %s658_s24 }
 0x105   : > { %s802_s18 = smov %s647_s21  ;;  %16 = sbr.rel (!%p14_p9) target bundleno = 3 (0x3), region = 71 }
 0x10a   :  { %423 = vsyncpa [#allocation3], 1 }
 0x10b   :  { %425 = vsyncpa [#allocation3 + $0x1], 1 }

</bundles_post_ra>
